<compile_context>
chip_gen: v7x
topology: tpu7x:2x2x1
jax: 0.10.0
libtpu: 0.0.40
codegen_flags: <defaults>
</compile_context>

<pallas_src>
import functools

import jax
import jax.numpy as jnp
from jax import lax
from jax.experimental import pallas as pl
from jax.experimental.pallas import tpu as pltpu


def _embed_gather_kernel(idx_ref, emb_hbm, out_hbm, sem, *, tok_tile):
    """Gather up to `tok_tile` embedding rows per grid step via row DMAs.

    idx_ref : SMEM (N,) int32        -- scalar-prefetched flat token indices
    emb_hbm : HBM  (V, D)            -- embedding table (never copied whole)
    out_hbm : HBM  (N, D)            -- gathered rows, written directly by DMA
    sem     : scalar DMA semaphore shared by all row copies of this step
    """
    n_tokens = out_hbm.shape[0]
    base = pl.program_id(0) * tok_tile
    # Last grid step may cover fewer than tok_tile tokens.
    rows = jnp.minimum(tok_tile, n_tokens - base)

    def _issue(t, carry):
        row = idx_ref[base + t]
        pltpu.make_async_copy(
            emb_hbm.at[pl.ds(row, 1), :],          # one table row (1, D)
            out_hbm.at[pl.ds(base + t, 1), :],     # its final output slot
            sem,
        ).start()
        return carry

    lax.fori_loop(0, rows, _issue, 0)

    def _wait(t, carry):
        # Descriptor only needs the right shape/dtype for the wait amount;
        # all row copies are identically sized (1, D).
        pltpu.make_async_copy(
            emb_hbm.at[pl.ds(0, 1), :],
            out_hbm.at[pl.ds(0, 1), :],
            sem,
        ).wait()
        return carry

    lax.fori_loop(0, rows, _wait, 0)


def embedding_lookup(embedding_matrix: jax.Array,
                     input_indices: jax.Array,
                     tok_tile: int = 128) -> jax.Array:
    """Pallas equivalent of `embedding_matrix[input_indices]`."""
    V, D = embedding_matrix.shape
    in_shape = input_indices.shape

    # Indices to the scalar path: flat int32, clamped (JAX gather semantics).
    idx_flat = jnp.clip(input_indices.reshape(-1).astype(jnp.int32), 0, V - 1)
    N = idx_flat.shape[0]

    itemsize = embedding_matrix.dtype.itemsize
    cost = pl.CostEstimate(
        flops=0,
        transcendentals=0,
        bytes_accessed=int(2 * N * D * itemsize + N * 4),  # read + write + idx
    )

    kernel = functools.partial(_embed_gather_kernel, tok_tile=tok_tile)

    out_flat = pl.pallas_call(
        kernel,
        out_shape=jax.ShapeDtypeStruct((N, D), embedding_matrix.dtype),
        grid_spec=pltpu.PrefetchScalarGridSpec(
            num_scalar_prefetch=1,                 # idx_flat -> SMEM
            grid=(pl.cdiv(N, tok_tile),),
            in_specs=[
                pl.BlockSpec(memory_space=pl.ANY),  # table stays in HBM
            ],
            out_specs=pl.BlockSpec(memory_space=pl.ANY),  # rows DMA'd to HBM
            scratch_shapes=[pltpu.SemaphoreType.DMA],
        ),
        compiler_params=pltpu.CompilerParams(
            dimension_semantics=("parallel",),      # megacore split on v7x
        ),
        cost_estimate=cost,
    )(idx_flat, embedding_matrix)

    return out_flat.reshape(*in_shape, D)


if __name__ == "__main__":
    vocab_size = 32
    embed_dim = 128
    batch, seq = 2, 8

    key = jax.random.PRNGKey(0)
    k_emb, k_idx = jax.random.split(key)

    # deterministic "parameter" init (stands in for torch.randn)
    embedding_matrix = jax.random.normal(
        k_emb, (vocab_size, embed_dim), dtype=jnp.float32
    )
    input_indices = jax.random.randint(
        k_idx, (batch, seq), minval=0, maxval=vocab_size, dtype=jnp.int32
    )

    out = embedding_lookup(embedding_matrix, input_indices)
    out = jax.block_until_ready(out)

    # sanity check against plain-JAX gather semantics (== torch indexing)
    ref = embedding_matrix[input_indices]
    assert out.shape == (batch, seq, embed_dim)
    assert jnp.allclose(out, ref, atol=1e-6, rtol=1e-6)

    print("KERNEL_OK")
</pallas_src>

<mosaic_0001>
module attributes {stable_mosaic.version = 11 : i64} {
  func.func @_embed_gather_kernel(%arg0: i32, %arg1: memref<16xi32, #tpu.memory_space<smem>>, %arg2: memref<32x128xf32, #tpu.memory_space<any>>, %arg3: memref<16x128xf32, #tpu.memory_space<any>>, %arg4: memref<!tpu.dma_semaphore, #tpu.memory_space<semaphore_mem>>) attributes {dimension_semantics = [#tpu.dimension_semantics<parallel>], iteration_bounds = array<i64: 1>, scalar_prefetch = 1 : i64, scratch_operands = 1 : i64, tpu.core_type = #tpu.core_type<tc>, window_params = [{}, {}]} {
    %c128_i32 = arith.constant 128 : i32
    %0 = arith.muli %arg0, %c128_i32 : i32
    %c16_i32 = arith.constant 16 : i32
    %1 = arith.subi %c16_i32, %0 : i32
    %c128_i32_0 = arith.constant 128 : i32
    %2 = arith.minsi %c128_i32_0, %1 : i32
    %c0_i32 = arith.constant 0 : i32
    %c0_i32_1 = arith.constant 0 : i32
    %3 = arith.subi %2, %c0_i32_1 : i32
    %4 = arith.addi %c0_i32_1, %3 : i32
    %c1_i32 = arith.constant 1 : i32
    scf.for %arg5 = %c0_i32_1 to %4 step %c1_i32  : i32 {
      %7 = arith.addi %0, %arg5 : i32
      %8 = arith.index_cast %7 : i32 to index
      %9 = memref.load %arg1[%8] : memref<16xi32, #tpu.memory_space<smem>>
      %10 = arith.addi %0, %arg5 : i32
      %c0_i32_5 = arith.constant 0 : i32
      %11 = tpu.memref_slice %arg2[%9, %c0_i32_5] : memref<32x128xf32, #tpu.memory_space<any>> -> memref<1x128xf32, #tpu.memory_space<any>>
      %c0_i32_6 = arith.constant 0 : i32
      %12 = tpu.memref_slice %arg3[%10, %c0_i32_6] : memref<16x128xf32, #tpu.memory_space<any>> -> memref<1x128xf32, #tpu.memory_space<any>>
      tpu.enqueue_dma source(%11 : memref<1x128xf32, #tpu.memory_space<any>>) target(%12 : memref<1x128xf32, #tpu.memory_space<any>>) target_semaphore(%arg4 : memref<!tpu.dma_semaphore, #tpu.memory_space<semaphore_mem>>)
    }
    %c0_i32_2 = arith.constant 0 : i32
    %c0_i32_3 = arith.constant 0 : i32
    %5 = arith.subi %2, %c0_i32_3 : i32
    %6 = arith.addi %c0_i32_3, %5 : i32
    %c1_i32_4 = arith.constant 1 : i32
    scf.for %arg5 = %c0_i32_3 to %6 step %c1_i32_4  : i32 {
      %c0_i32_5 = arith.constant 0 : i32
      %c0_i32_6 = arith.constant 0 : i32
      %7 = tpu.memref_slice %arg2[%c0_i32_5, %c0_i32_6] : memref<32x128xf32, #tpu.memory_space<any>> -> memref<1x128xf32, #tpu.memory_space<any>>
      %c0_i32_7 = arith.constant 0 : i32
      %c0_i32_8 = arith.constant 0 : i32
      %8 = tpu.memref_slice %arg3[%c0_i32_7, %c0_i32_8] : memref<16x128xf32, #tpu.memory_space<any>> -> memref<1x128xf32, #tpu.memory_space<any>>
      tpu.wait_dma2 semaphore(%arg4 : memref<!tpu.dma_semaphore, #tpu.memory_space<semaphore_mem>>) src(%7 : memref<1x128xf32, #tpu.memory_space<any>>) dst(%8 : memref<1x128xf32, #tpu.memory_space<any>>)
    }
    return
  }
}

</mosaic_0001>

<bundles_post_ra>
// kernel: tpu_custom_call.1
= control target key start
LH: loop header
LB: loop body
LE: loop exit
PB: predicated region body
PF: predicated region fallthrough
CT: control target
= control target key end

     0   :  { %s159_s0 = inlined_call_operand.hbm [shape: s32[16], index: 0, kind: input, shape index: {}]   ;;  %s160_s1 = inlined_call_operand.hbm [shape: f32[32,128], index: 1, kind: input, shape index: {}]   ;;  %s161_s2 = inlined_call_operand.hbm [shape: f32[16,128], index: 2, kind: output, shape index: {}]  }
   0x1   :  { %s92_s11 = scalar_lea.hbm %s159_s0, 16 }
   0x2   :  { %p93_p0 = scmp.ne.s32.totalorder %s159_s0, %s92_s11  ;;  %p96_p1 = scmp.lt.u32.totalorder %s92_s11, %s159_s0 }
   0x4   :  { %p98_p2 = pnand %p96_p1, %p93_p0 }
   0x6   :  { %101 = shalt.err (!%p98_p2)  }
   0x7   :  { %s122_s16 = smov [#allocation4]  }
   0x8   :  { %8 = dma.hbm_to_smem %s159_s0, 16, %s122_s16, [#allocation3] }
   0x9   :  { %110 = dma.done.wait [#allocation3], 16 }
   0xa   :  { %111 = vsyncadd [#allocation3], 4294967280 }
   0xb   :  { %10 = sfence }
   0xc   :  { %s114_s19 = smov 0  }
   0xd LB: > { %s22_s20 = sld [smem:[#allocation4 + %s116_s19]]  ;;  %s70_s21 = sshll.u32 %s116_s19, 4  ;;  %s116_s19 = sphi %s114_s19, %s18_s19  }
   0xe   : > { %s26_s24 = scalar_lea.hbm %s161_s2, %s70_s21  ;;  %s123_s29 = smov [#allocation2]  }
   0xf   : > { %s124_s0 = smov [#allocation5]   ;;  %s125_s30 = smov 0  }
  0x10   : > { %s18_s19 = sadd.s32 1, %s116_s19  }
  0x11   : > { %p17_p3 = scmp.ge.s32.totalorder %s18_s19, 16 }
  0x12   :  { %s118_s3 = smov (%p17_p3), 0  }
  0x13   : > { %s69_s25 = sshll.u32 %s22_s20, 4  ;;  %20 = sbr.rel (!%p17_p3) target bundleno = 13 (0xd), region = 28 }
  0x14   : > { %s24_s28 = scalar_lea.hbm %s160_s1, %s69_s25 }
  0x15   : > { %39 = dma.general %s24_s28, 16, %s26_s24, %s123_s29, %s124_s0, [#allocation6], %s125_s30, 0  }
  0x1a LB: > { %112 = dma.done.wait [#allocation2], 16  ;;  %s120_s3 = sphi %s118_s3, %s43_s3  }
  0x1b   : > { %113 = vsyncadd [#allocation2], 4294967280  ;;  %s43_s3 = sadd.s32 1, %s120_s3  }
  0x1c   : > { %p42_p4 = scmp.ge.s32.totalorder %s43_s3, 16 }
  0x1e   :  { %45 = sbr.rel (!%p42_p4) target bundleno = 26 (0x1a), region = 39 }
  0x25   :  { %49 = vsyncmov [#allocation2] }
  0x28   :  { %s50_s4 = vpop.sfrf %49 }
  0x29   :  { %p71_p5 = scmp.ne.s32.totalorder %s50_s4, 0 }
  0x2b   :  { %54 = shalt.err (%p71_p5)  }

</bundles_post_ra>
